<compile_context>
chip_gen: v6e
topology: v6e:2x2x1
jax: 0.10.0
libtpu: 0.0.40
codegen_flags: <defaults>
</compile_context>

<pallas_src>
import math

import jax
import jax.numpy as jnp
import numpy as np
from jax import lax
from jax.experimental import pallas as pl
from jax.experimental.pallas import tpu as pltpu

LN_EPS = 1e-5  # nn.LayerNorm default


def _round_up(a, b):
    return (a + b - 1) // b * b


def _patch_embed_kernel(x_ref, w_ref, p_ref, o_ref):
    # x_ref: (tm, K) bf16 patches; w_ref: (K, N) bf16 projection weight;
    # p_ref: (8, N) f32 with rows [conv_bias, ln_gamma, ln_beta, 0, ...];
    # o_ref: (tm, N) output (bf16 by default).
    y = jnp.dot(x_ref[...], w_ref[...], preferred_element_type=jnp.float32)
    params = p_ref[...]
    y = y + params[0:1, :]                                        # conv bias

    # Two-pass LayerNorm statistics in f32 (robust vs. E[y^2]-E[y]^2).
    mean = jnp.mean(y, axis=-1, keepdims=True)
    centered = y - mean
    var = jnp.mean(centered * centered, axis=-1, keepdims=True)   # biased, like PyTorch
    y_norm = centered * lax.rsqrt(var + LN_EPS)                   # rsqrt -> EUP slot
    o_ref[...] = (y_norm * params[1:2, :] + params[2:3, :]).astype(o_ref.dtype)


def _im2col_nhwc(x, kh, kw, stride, ph, pw, dtype):
    """x: (B, C, H, W) -> (B, Hout*Wout, kh*kw*C) with K ordered (kh, kw, C).

    Only the small, un-expanded input is transposed to NHWC; the expanded patch
    tensor is written directly in its final (M, K) layout. The matching weight
    reorder (cheap) happens in patch_embed.
    """
    B, C, H, W = x.shape
    Hout = (H + 2 * ph - kh) // stride + 1
    Wout = (W + 2 * pw - kw) // stride + 1
    xnhwc = jnp.transpose(x.astype(dtype), (0, 2, 3, 1))          # (B, H, W, C)
    xp = jnp.pad(xnhwc, ((0, 0), (ph, ph), (pw, pw), (0, 0)))
    cols = []
    for ki in range(kh):
        for kj in range(kw):
            cols.append(
                xp[:, ki:ki + Hout * stride:stride, kj:kj + Wout * stride:stride, :]
            )                                                      # (B, Hout, Wout, C)
    patches = jnp.stack(cols, axis=3)                              # (B, Hout, Wout, kh*kw, C)
    return patches.reshape(B, Hout * Wout, kh * kw * C), Hout, Wout


def _default_tm():
    # v5e/v6e have 128 MiB VMEM -> 512-row tiles (closer to HBM roofline);
    # v7x has 64 MiB per TensorCore -> stay at 256.
    try:
        return 256 if pltpu.get_tpu_info().vmem_capacity_bytes <= (64 << 20) else 512
    except Exception:
        return 256


def _pick_tm(M, K, N, requested_tm, in_bytes, out_bytes, align=16):
    tm = max(align, min(_round_up(requested_tm, align), _round_up(M, align)))
    # Give the 1-D "parallel" grid at least 2 steps so both v7x TCs get work.
    if M > align and pl.cdiv(M, tm) < 2:
        tm = max(align, _round_up(pl.cdiv(M, 2), align))

    # Keep the double-buffered per-step footprint under the ~32 MiB scoped-VMEM
    # default on every generation (weight/params have constant index maps but are
    # still double-buffered by the pipeline).
    budget = 28 << 20

    def footprint(t):
        return 2 * (t * K * in_bytes + K * N * in_bytes + 8 * N * 4 + t * N * out_bytes)

    while tm > align and footprint(tm) > budget:
        tm = max(align, _round_up(tm // 2, align))
    return tm


def patch_embed(x, conv_w, conv_b, ln_g, ln_b, *, stride,
                tm=None, compute_dtype=jnp.bfloat16, out_dtype=jnp.bfloat16):
    """Forward pass of PatchEmbed.

    x:      (B, C, H, W)           NCHW, like PyTorch
    conv_w: (embed_dim, C, kh, kw) OIHW, like PyTorch Conv2d.weight
    conv_b, ln_g, ln_b: (embed_dim,)
    Returns (tokens, Hout, Wout) with tokens of shape (B, Hout*Wout, embed_dim).
    """
    B, C, H, W = x.shape
    N, _, kh, kw = conv_w.shape
    # padding = patch_size // 2, exactly as the module constructs its Conv2d.
    ph, pw = kh // 2, kw // 2

    patches, Hout, Wout = _im2col_nhwc(x, kh, kw, stride, ph, pw, compute_dtype)
    M = B * Hout * Wout
    K = C * kh * kw
    x2d = patches.reshape(M, K)                                     # no padding at all

    # Reorder the small weight once to (kh, kw, C, N) -> (K, N), matching im2col K order.
    w2d = jnp.transpose(conv_w, (2, 3, 1, 0)).reshape(K, N).astype(compute_dtype)

    # Pack bias / gamma / beta into one full-sublane (8, N) f32 tile (rows 3..7 zero).
    params = jnp.zeros((8, N), jnp.float32)
    params = params.at[0].set(conv_b.astype(jnp.float32))
    params = params.at[1].set(ln_g.astype(jnp.float32))
    params = params.at[2].set(ln_b.astype(jnp.float32))

    in_bytes = jnp.dtype(compute_dtype).itemsize
    out_bytes = jnp.dtype(out_dtype).itemsize
    if tm is None:
        tm = _default_tm()
    tm = _pick_tm(M, K, N, tm, in_bytes, out_bytes)
    grid = (pl.cdiv(M, tm),)

    cost = pl.CostEstimate(
        flops=2 * M * K * N,
        transcendentals=M,  # one rsqrt per token row
        bytes_accessed=(M * K + K * N) * in_bytes + M * N * out_bytes + 8 * N * 4,
    )

    out = pl.pallas_call(
        _patch_embed_kernel,
        out_shape=jax.ShapeDtypeStruct((M, N), out_dtype),
        grid_spec=pltpu.PrefetchScalarGridSpec(
            num_scalar_prefetch=0,
            grid=grid,
            in_specs=[
                pl.BlockSpec((tm, K), lambda i: (i, 0)),   # K == full last dim -> exempt
                pl.BlockSpec((K, N), lambda i: (0, 0)),    # full-array block (resident)
                pl.BlockSpec((8, N), lambda i: (0, 0)),    # packed bias/gamma/beta
            ],
            out_specs=pl.BlockSpec((tm, N), lambda i: (i, 0)),
        ),
        compiler_params=pltpu.CompilerParams(
            dimension_semantics=("parallel",),  # M axis shards across TensorCores on v7x
        ),
        cost_estimate=cost,
    )(x2d, w2d, params)

    tokens = out.reshape(B, Hout * Wout, N)
    return tokens, Hout, Wout


def _reference(x, conv_w, conv_b, ln_g, ln_b, *, stride):
    """Pure-JAX reference mirroring the PyTorch forward (f32 conv + LayerNorm)."""
    kh, kw = conv_w.shape[2], conv_w.shape[3]
    ph, pw = kh // 2, kw // 2
    y = lax.conv_general_dilated(
        x, conv_w, window_strides=(stride, stride),
        padding=((ph, ph), (pw, pw)),
        dimension_numbers=("NCHW", "OIHW", "NCHW"),
        precision=lax.Precision.HIGHEST,
    ) + conv_b[None, :, None, None]
    B, N, Hout, Wout = y.shape
    t = jnp.transpose(y.reshape(B, N, Hout * Wout), (0, 2, 1))  # (B, HW, N)
    mean = jnp.mean(t, axis=-1, keepdims=True)
    var = jnp.mean((t - mean) ** 2, axis=-1, keepdims=True)
    t = (t - mean) / jnp.sqrt(var + LN_EPS) * ln_g + ln_b
    return t, Hout, Wout


if __name__ == "__main__":
    # Small shapes consistent with the module: batch=2, in_chans=4, 16x16 image,
    # patch_size=7, stride=4, embed_dim=32.
    B, C, H, W = 2, 4, 16, 16
    patch_size, stride, embed_dim = 7, 4, 32

    key = jax.random.PRNGKey(0)
    kx, kw_ = jax.random.split(key)

    x = jax.random.normal(kx, (B, C, H, W), dtype=jnp.float32)

    # Deterministic init mirroring PatchEmbed._init_weights:
    #   Conv2d: normal(0, sqrt(2 / fan_out)), bias = 0
    #   LayerNorm: weight = 1, bias = 0
    fan_out = patch_size * patch_size * embed_dim
    conv_w = jax.random.normal(
        kw_, (embed_dim, C, patch_size, patch_size), dtype=jnp.float32
    ) * math.sqrt(2.0 / fan_out)
    conv_b = jnp.zeros((embed_dim,), jnp.float32)
    ln_g = jnp.ones((embed_dim,), jnp.float32)
    ln_b = jnp.zeros((embed_dim,), jnp.float32)

    out, Hout, Wout = patch_embed(x, conv_w, conv_b, ln_g, ln_b, stride=stride)
    out = jax.block_until_ready(out)

    # Reference uses the same bf16 quantization of the matmul operands so the
    # comparison isolates kernel correctness (f32 accumulation + f32 LayerNorm)
    # from the intended bf16 MXU cast. Tolerance covers the bf16 output writeback
    # (~0.4% relative rounding on O(1) LayerNorm outputs).
    xq = x.astype(jnp.bfloat16).astype(jnp.float32)
    wq = conv_w.astype(jnp.bfloat16).astype(jnp.float32)
    ref, Hr, Wr = _reference(xq, wq, conv_b, ln_g, ln_b, stride=stride)
    assert (Hout, Wout) == (Hr, Wr)
    np.testing.assert_allclose(
        np.asarray(out, dtype=np.float32), np.asarray(ref), rtol=2e-2, atol=2e-2
    )

    print("KERNEL_OK")
</pallas_src>

<mosaic_0001>
module attributes {stable_mosaic.version = 11 : i64} {
  func.func @_patch_embed_kernel(%arg0: i32, %arg1: memref<16x196xbf16, #tpu.memory_space<vmem>>, %arg2: memref<196x32xbf16, #tpu.memory_space<vmem>>, %arg3: memref<8x32xf32, #tpu.memory_space<vmem>>, %arg4: memref<16x32xbf16, #tpu.memory_space<vmem>>) attributes {dimension_semantics = [#tpu.dimension_semantics<parallel>], iteration_bounds = array<i64: 2>, scalar_prefetch = 0 : i64, scratch_operands = 0 : i64, tpu.core_type = #tpu.core_type<tc>, window_params = [{transform_indices = @transform_0, window_bounds = array<i64: 16, 196>}, {pipeline_mode = #tpu.pipeline_mode<synchronous>, transform_indices = @transform_1, window_bounds = array<i64: 196, 32>}, {pipeline_mode = #tpu.pipeline_mode<synchronous>, transform_indices = @transform_2, window_bounds = array<i64: 8, 32>}, {transform_indices = @transform_3, window_bounds = array<i64: 16, 32>}]} {
    %c0 = arith.constant 0 : index
    %c0_0 = arith.constant 0 : index
    %0 = vector.load %arg1[%c0, %c0_0] : memref<16x196xbf16, #tpu.memory_space<vmem>>, vector<16x196xbf16>
    %c0_1 = arith.constant 0 : index
    %c0_2 = arith.constant 0 : index
    %1 = vector.load %arg2[%c0_1, %c0_2] : memref<196x32xbf16, #tpu.memory_space<vmem>>, vector<196x32xbf16>
    %cst = arith.constant dense<0.000000e+00> : vector<16x32xf32>
    %2 = tpu.matmul %0, %1, %cst {dimension_numbers = #tpu.dot_dimension_numbers<[1], [0], [0], [1], [0, 0, 1, 1], [], []>} : vector<16x196xbf16>, vector<196x32xbf16>, vector<16x32xf32> -> vector<16x32xf32>
    %c0_3 = arith.constant 0 : index
    %c0_4 = arith.constant 0 : index
    %3 = vector.load %arg3[%c0_3, %c0_4] : memref<8x32xf32, #tpu.memory_space<vmem>>, vector<8x32xf32>
    %4 = vector.extract_strided_slice %3 {offsets = [0, 0], sizes = [1, 32], strides = [1, 1]} : vector<8x32xf32> to vector<1x32xf32>
    %5 = vector.broadcast %4 : vector<1x32xf32> to vector<16x32xf32>
    %6 = arith.addf %2, %5 : vector<16x32xf32>
    %cst_5 = arith.constant dense<0.000000e+00> : vector<16xf32>
    %7 = vector.multi_reduction <add>, %6, %cst_5 [1] : vector<16x32xf32> to vector<16xf32>
    %8 = vector.shape_cast %7 : vector<16xf32> to vector<16x1xf32>
    %cst_6 = arith.constant 3.200000e+01 : f32
    %9 = vector.broadcast %cst_6 : f32 to vector<16x1xf32>
    %10 = arith.divf %8, %9 : vector<16x1xf32>
    %11 = vector.broadcast %10 : vector<16x1xf32> to vector<16x32xf32>
    %12 = arith.subf %6, %11 : vector<16x32xf32>
    %13 = arith.mulf %12, %12 : vector<16x32xf32>
    %cst_7 = arith.constant dense<0.000000e+00> : vector<16xf32>
    %14 = vector.multi_reduction <add>, %13, %cst_7 [1] : vector<16x32xf32> to vector<16xf32>
    %15 = vector.shape_cast %14 : vector<16xf32> to vector<16x1xf32>
    %cst_8 = arith.constant 3.200000e+01 : f32
    %16 = vector.broadcast %cst_8 : f32 to vector<16x1xf32>
    %17 = arith.divf %15, %16 : vector<16x1xf32>
    %cst_9 = arith.constant 9.99999974E-6 : f32
    %18 = vector.broadcast %cst_9 : f32 to vector<16x1xf32>
    %19 = arith.addf %17, %18 : vector<16x1xf32>
    %20 = math.rsqrt %19 : vector<16x1xf32>
    %21 = vector.broadcast %20 : vector<16x1xf32> to vector<16x32xf32>
    %22 = arith.mulf %12, %21 : vector<16x32xf32>
    %23 = vector.extract_strided_slice %3 {offsets = [1, 0], sizes = [1, 32], strides = [1, 1]} : vector<8x32xf32> to vector<1x32xf32>
    %24 = vector.broadcast %23 : vector<1x32xf32> to vector<16x32xf32>
    %25 = arith.mulf %22, %24 : vector<16x32xf32>
    %26 = vector.extract_strided_slice %3 {offsets = [2, 0], sizes = [1, 32], strides = [1, 1]} : vector<8x32xf32> to vector<1x32xf32>
    %27 = vector.broadcast %26 : vector<1x32xf32> to vector<16x32xf32>
    %28 = arith.addf %25, %27 : vector<16x32xf32>
    %29 = arith.truncf %28 : vector<16x32xf32> to vector<16x32xbf16>
    %c0_10 = arith.constant 0 : index
    %c0_11 = arith.constant 0 : index
    %30 = vector.load %arg4[%c0_10, %c0_11] : memref<16x32xbf16, #tpu.memory_space<vmem>>, vector<16x32xbf16>
    tpu.vector_store %arg4[%c0_10, %c0_11], %29 {strides = array<i32>} : memref<16x32xbf16, #tpu.memory_space<vmem>>, vector<16x32xbf16>,
    return
  }
  func.func @transform_0(%arg0: i32) -> (i32, i32) {
    %c0_i32 = arith.constant 0 : i32
    %c0_i32_0 = arith.constant 0 : i32
    return %arg0, %c0_i32 : i32, i32
  }
  func.func @transform_1(%arg0: i32) -> (i32, i32) {
    %c0_i32 = arith.constant 0 : i32
    %c0_i32_0 = arith.constant 0 : i32
    %c0_i32_1 = arith.constant 0 : i32
    return %c0_i32, %c0_i32_0 : i32, i32
  }
  func.func @transform_2(%arg0: i32) -> (i32, i32) {
    %c0_i32 = arith.constant 0 : i32
    %c0_i32_0 = arith.constant 0 : i32
    %c0_i32_1 = arith.constant 0 : i32
    return %c0_i32, %c0_i32_0 : i32, i32
  }
  func.func @transform_3(%arg0: i32) -> (i32, i32) {
    %c0_i32 = arith.constant 0 : i32
    %c0_i32_0 = arith.constant 0 : i32
    return %arg0, %c0_i32 : i32, i32
  }
}

</mosaic_0001>

<bundles_post_ra>
// kernel: tpu_custom_call.1
= control target key start
LH: loop header
LB: loop body
LE: loop exit
PB: predicated region body
PF: predicated region fallthrough
CT: control target
= control target key end

     0   :  { %8 = vsyncpa [#allocation3], 0  ;;  %s802_s0 = inlined_call_operand.vmem [shape: bf16[32,196], index: 0, kind: input, shape index: {}]   ;;  %s803_s1 = inlined_call_operand.vmem [shape: bf16[196,32], index: 1, kind: input, shape index: {}]   ;;  %s804_s2 = inlined_call_operand.vmem [shape: f32[8,32], index: 2, kind: input, shape index: {}]   ;;  %s805_s3 = inlined_call_operand.hbm [shape: bf16[32,32], index: 3, kind: output, shape index: {}]  }
   0x1   :  { %10 = vsyncpa [#allocation3 + $0x1], 0  ;;  %s651_s12 = smov 0   ;;  %s653_s13 = smov 0  }
   0x2   :  { %s655_s14 = smov 0   ;;  %s657_s15 = smov 0  }
   0x3 LB: > { %s672_s16 = sadd.s32 4294967295, %s625_s15   ;;  %s468_s17 = sadd.s32 4294967294, %s625_s15   ;;  %s625_s15 = sphi %s657_s15, %s811_s15   ;;  %s621_s14 = sphi %s655_s14, %s810_s14   ;;  %s617_s13 = sphi %s653_s13, %s809_s13   ;;  %s613_s12 = sphi %s651_s12, %s808_s12  }
   0x4   : > { %s676_s18 = sadd.s32 1, %s625_s15   ;;  %s91_s19 = sadd.s32 1, %s621_s14 }
   0x5   : > { %s88_s20 = ssub.s32 %s625_s15, %s676_s18  ;;  %p101_p0 = scmp.ne.s32.totalorder %s621_s14, %s617_s13 }
   0x6   : > { %p89_p1 = scmp.eq.s32.totalorder %s88_s20, 0  ;;  %p102_p2 = scmp.eq.s32.totalorder %s672_s16, 1 }
   0x7   : > { %p107_p3 = scmp.ne.s32.totalorder %s617_s13, %s613_s12  ;;  %p108_p4 = scmp.eq.s32.totalorder %s468_s17, 1 }
   0x8   : > { %s687_s21 = scalar_select %p89_p1, %s621_s14, %s91_s19  }
   0x9   : > { %p689_p5 = por %p102_p2, %p101_p0  ;;  %p693_p6 = por %p108_p4, %p107_p3 }
   0xa   : > { %p471_p7 = scmp.ge.s32.totalorder %s625_s15, 1  ;;  %p142_p8 = scmp.lt.s32.totalorder %s625_s15, 3 }
   0xc   : > { %p143_p9 = pnand %p471_p7, %p142_p8 }
   0xd   : > { %s473_s28 = sshll.u32 (!%p143_p9), %s672_s16, 1  ;;  %s502_s20 = sshll.u32 (!%p143_p9), %s672_s16, 7 }
   0xe   : > { %146 = sbr.rel (%p143_p9) target bundleno = 595 (0x253), region = 32  ;;  %p168_p10 = scmp.lt.s32.totalorder (!%p143_p9), %s473_s28, 3 }
   0xf   : > { %s628_s16 = smov (!%p143_p9), [#allocation2]  }
  0x13   : > { %v545_v0 = vld [vmem:[%s803_s1 + $0x38] sm:$0xff]   ;;  %v627_v1 = vmov 0   ;;  %v546_v2 = vld [vmem:[%s803_s1 + $0x30] sm:$0xff]   ;;  %s813_s28 = smov (!%p168_p10, %s473_s28), 3  ;;  %v547_v3 = vld [vmem:[%s803_s1 + $0x28] sm:$0xff]   ;;  %vm292_vm0 = vcmask 556032   ;;  %v204_v17 = vlaneseq }
  0x14   : > { %300 = vmatprep.subr.bf16.mxu0 %v627_v1  ;;  %s499_s4 = sshll.u32 %s813_s28, 3  ;;  %v548_v4 = vld [vmem:[%s803_s1 + $0x20] sm:$0xff]   ;;  %v549_v6 = vld [vmem:[%s803_s1 + $0x18] sm:$0xff]   ;;  %v550_v7 = vld [vmem:[%s803_s1 + $0x10] sm:$0xff]   ;;  %vm296_vm1 = vcmask 1041408   ;;  %vm341_vm2 = vcmask 261120   ;;  %s758_s28 = scalar_lea.hbm %s805_s3, %s502_s20 }
  0x15   : > { %301 = vmatpush1.bf16.msra.mxu0 %v545_v0  ;;  %s715_s9 = scalar_lea.vmem %s802_s0, %s499_s4  ;;  %v551_v8 = vld [vmem:[%s803_s1 + $0x8] sm:$0xff]   ;;  %v552_v9 = vld [vmem:[%s803_s1] sm:$0xff]   ;;  %v554_v12 = vld [vmem:[%s803_s1 + $0x58] sm:$0xff]   ;;  %v205_v18 = vshrl.u32 %v204_v17, 7  ;;  %vm389_vm3 = vcmask 257024   ;;  %s569_s4 = sshll.u32 %s628_s16, 4  ;;  %s570_s4 = int_to_ptr.vmem [resolvable:$false] %s569_s4 }
  0x16   : > { %302 = vmatprep.subr.bf16.mxu0 %v627_v1  ;;  %v560_v5 = vld [vmem:[%s715_s9 + $0x4] ss:$8 sps:$4 sm:$0xff]   ;;  %v553_v10 = vld [vmem:[%s803_s1 + $0x60] ss:$0 sps:$4 sm:$0x33]   ;;  %v555_v13 = vld [vmem:[%s803_s1 + $0x50] sm:$0xff]  }
  0x17   : > { %491 = vmatprep.mubr.msk.bf16.mxu0 %vm292_vm0, %v560_v5  ;;  %v298_v11 = vsel %vm296_vm1, %v553_v10, 0  ;;  %v556_v14 = vld [vmem:[%s803_s1 + $0x48] sm:$0xff]   ;;  %v557_v15 = vld [vmem:[%s803_s1 + $0x40] sm:$0xff]   ;;  %v206_v19 = vsub.s32 0, %v205_v18  ;;  %v371_v46 = vsub.s32 1, %v205_v18  ;;  %v377_v47 = vsub.s32 2, %v205_v18 }
  0x18   : > { %v558_v16 = vld [vmem:[%s715_s9] ss:$8 sps:$4 sm:$0xff]   ;;  %s164_s9 = sand.u32 1, %s617_s13   ;;  %s571_s5 = scalar_lea.vmem %s570_s4, 256 }
  0x19   : > { %303 = vmatpush1.bf16.msra.mxu0 %v546_v2  ;;  %v203_v20 = vld [vmem:[%s804_s2] sm:$0xff]  ;;  %s472_s19 = sshll.u32 %s164_s9, 3  ;;  %s762_s29 = scalar_lea.sflag [#allocation3], %s164_s9 }
  0x1a   : > { %304 = vmatprep.subr.bf16.mxu0 %v627_v1  ;;  %v207_v21 = vrot.slane %v203_v20, %v206_v19  ;;  %v372_v48 = vrot.slane %v203_v20, %v371_v46  ;;  %v378_v50 = vrot.slane %v203_v20, %v377_v47  ;;  %s166_s24 = scalar_lea.vmem [#allocation2], %s472_s19 }
  0x1b   : > { %s406_s25 = sshll.u32 %s166_s24, 4  ;;  %s760_s25 = int_to_ptr.vmem [resolvable:$true] %s406_s25 }
  0x1c   : > { %s565_s30 = scalar_lea.vmem %s760_s25, 128  ;;  %p572_p0 = scmp.lt.s32.totalorder %s760_s25, %s570_s4 }
  0x1d   : > { %305 = vmatpush1.bf16.msra.mxu0 %v547_v3  ;;  %p566_p11 = scmp.ne.s32.totalorder %s760_s25, %s565_s30  ;;  %p573_p1 = scmp.lt.s32.totalorder %s571_s5, %s565_s30 }
  0x1e   : > { %306 = vmatprep.subr.bf16.mxu0 %v627_v1 }
  0x1f   : > { %p567_p12 = pnand %p566_p11, %p689_p5  ;;  %p574_p2 = por %p573_p1, %p572_p0 }
  0x21   : > { %307 = vmatpush1.bf16.msra.mxu0 %v548_v4  ;;  %p568_p13 = pneg %p567_p12 }
  0x22   : > { %308 = vmatprep.subr.bf16.mxu0 %v627_v1 }
  0x23   : > { %p575_p3 = pnand %p574_p2, %p568_p13 }
  0x25   : > { %309 = vmatpush1.bf16.msra.mxu0 %v549_v6 }
  0x26   : > { %310 = vmatprep.subr.bf16.mxu0 %v627_v1 }
  0x29   : > { %311 = vmatpush1.bf16.msra.mxu0 %v550_v7 }
  0x2a   : > { %312 = vmatprep.subr.bf16.mxu0 %v627_v1 }
  0x2d   : > { %313 = vmatpush1.bf16.msra.mxu0 %v551_v8 }
  0x2e   : > { %314 = vmatprep.subr.bf16.mxu0 %v627_v1 }
  0x31   : > { %315 = vmatpush1.bf16.msra.mxu0 %v552_v9 }
  0x32   : > { %322 = vmatprep.subr.bf16.mxu0 %v627_v1 }
  0x35   : > { %323 = vmatpush2.bf16.msra.mxu0 %v298_v11 }
  0x36   : > { %324 = vmatprep.subr.bf16.mxu0 %v627_v1 }
  0x39   : > { %325 = vmatpush2.bf16.msra.mxu0 %v554_v12 }
  0x3a   : > { %326 = vmatprep.subr.bf16.mxu0 %v627_v1 }
  0x3d   : > { %327 = vmatpush2.bf16.msra.mxu0 %v555_v13 }
  0x3e   : > { %328 = vmatprep.subr.bf16.mxu0 %v627_v1 }
  0x41   : > { %329 = vmatpush2.bf16.msra.mxu0 %v556_v14 }
  0x42   : > { %330 = vmatprep.subr.bf16.mxu0 %v627_v1 }
  0x45   : > { %331 = vmatpush2.bf16.msra.mxu0 %v557_v15 }
  0x48   : > { %333 = vmatmul.mubr.bf16.vlgmr.msra.gmra.mxu0 %v558_v16 }
 0x108   : > { %v334_v22 = vpop.f32.mrf.mxu0 }
 0x109   : > { %v335_v23 = vadd.f32 %v334_v22, %v207_v21 }
 0x10a   : > { %v336_v24 = vpop.f32.mrf.mxu0 }
 0x10b   : > { %v342_v25 = vsel %vm341_vm2, %v335_v23, 0.0 }
 0x10c   : > { %v337_v26 = vpop.f32.mrf.mxu0  ;;  %343 = vadd.xlane.f32.xlu0 %v342_v25 }
 0x10d   : > { %v338_v27 = vadd.f32 %v337_v26, %v207_v21 }
 0x10e   : > { %v339_v28 = vpop.f32.mrf.mxu0 }
 0x10f   : > { %v345_v29 = vsel %vm341_vm2, %v338_v27, 0.0 }
 0x110   : > { %346 = vadd.xlane.f32.xlu0 %v345_v29 }
 0x195   : > { %v344_v30 = vpop.xlane.xlu0 %343 }
 0x196   : > { %v349_v31 = vmul.f32 0.03125, %v344_v30 }
 0x198   : > { %v351_v32 = vsub.f32 %v335_v23, %v349_v31 }
 0x199   : > { %v347_v33 = vpop.xlane.xlu0 %346 }
 0x19a   : > { %v350_v34 = vmul.f32 0.03125, %v347_v33  ;;  %v353_v35 = vmul.f32 %v351_v32, %v351_v32 }
 0x19c   : > { %v352_v36 = vsub.f32 %v338_v27, %v350_v34  ;;  %v355_v37 = vsel %vm341_vm2, %v353_v35, 0.0 }
 0x19d   : > { %356 = vadd.xlane.f32.xlu1 %v355_v37 }
 0x19e   : > { %v354_v38 = vmul.f32 %v352_v36, %v352_v36 }
 0x1a0   : > { %v358_v39 = vsel %vm341_vm2, %v354_v38, 0.0 }
 0x1a1   : > { %359 = vadd.xlane.f32.xlu1 %v358_v39 }
 0x226   : > { %v357_v40 = vpop.xlane.xlu1 %356 }
 0x227   : > { %v361_v41 = vmul.f32 0.03125, %v357_v40 }
 0x229   : > { %v363_v42 = vadd.f32 1e-05, %v361_v41 }
 0x22a   : > { %v360_v43 = vpop.xlane.xlu1 %359 }
 0x22b   : > { %561 = vrsqrt.f32 %v363_v42  ;;  %v362_v44 = vmul.f32 0.03125, %v360_v43 }
 0x22d   : > { %v364_v45 = vadd.f32 1e-05, %v362_v44 }
 0x22f   : > { %563 = vrsqrt.f32 %v364_v45 }
 0x238   : > { %v562_v49 = vpop.eup %561 }
 0x239   : > { %v367_v51 = vmul.f32 %v562_v49, %v351_v32 }
 0x23b   : > { %v373_v52 = vmul.f32 %v372_v48, %v367_v51 }
 0x23c   : > { %v564_v53 = vpop.eup %563 }
 0x23d   : > { %v368_v54 = vmul.f32 %v564_v53, %v352_v36  ;;  %v379_v55 = vadd.f32 %v378_v50, %v373_v52 }
 0x23f   : > { %v374_v56 = vmul.f32 %v372_v48, %v368_v54  ;;  %v500_v57 = vpack.c.bf16 %v379_v55, %v379_v55 }
 0x241   : > { %v380_v58 = vadd.f32 %v378_v50, %v374_v56  ;;  %390 = vst.msk [vmem:[%s166_s24] sm:$0xf] %vm389_vm3, %v500_v57 }
 0x243   : > { %v501_v59 = vpack.c.bf16 %v380_v58, %v380_v58 }
 0x245   : > { %391 = vst.msk [vmem:[%s166_s24 + $0x4] sm:$0xf] %vm389_vm3, %v501_v59 }
 0x246   : > { %578 = shalt.err (!%p575_p3)
}
 0x247   : > { %s579_s6 = scalar_lea.hbm %s758_s28, 128  ;;  %s583_s10 = scalar_lea.hbm %s805_s3, 256 }
 0x248   : > { %p580_p4 = scmp.ne.s32.totalorder %s758_s28, %s579_s6  ;;  %p584_p9 = scmp.lt.s32.totalorder %s758_s28, %s805_s3 }
 0x249   : > { %p585_p10 = scmp.lt.s32.totalorder %s583_s10, %s579_s6 }
 0x24a   : > { %p581_p7 = pnand %p580_p4, %p689_p5 }
 0x24b   : > { %p586_p11 = por %p585_p10, %p584_p9 }
 0x24c   : > { %p582_p8 = pneg %p581_p7 }
 0x24e   : > { %p587_p12 = pnand %p586_p11, %p582_p8 }
 0x250   : > { %590 = shalt.err (!%p587_p12)
}
 0x251   : > { %s629_s9 = smov 64   ;;  %s630_s19 = smov 4  }
 0x252   : > { %503 = dma.vmem_to_hbm [thread:$0]  (%p689_p5), %s760_s25, 128, %s758_s28, %s762_s29, %s629_s9, %s629_s9, %s630_s19  }
 0x253 PF: > { %p509_p13 = scmp.ge.s32.totalorder %s625_s15, 2  ;;  %s421_s20 = sand.u32 1, %s613_s12  }
 0x254   : > { %s422_s24 = scalar_lea.sflag [#allocation3], %s421_s20 }
 0x255   : > { %p506_p0 = pnand %p509_p13, %p693_p6 }
 0x257   : > { %p507_p1 = pneg %p506_p0 }
 0x259   : > { %608 = dma.done.wait (%p507_p1), %s422_s24, 128  }
 0x25a   : > { %610 = vsyncadd (%p507_p1), %s422_s24, 4294967168  ;;  %p13_p2 = scmp.ge.s32.totalorder %s676_s18, 4   ;;  %s808_s12 = smov %s617_s13 }
 0x25b   : > { %s809_s13 = smov %s621_s14  ;;  %s810_s14 = smov %s687_s21 }
 0x25c   : > { %s811_s15 = smov %s676_s18  ;;  %15 = sbr.rel (!%p13_p2) target bundleno = 3 (0x3), region = 67 }
 0x261   :  { %427 = vsyncpa [#allocation3], 1 }
 0x262   :  { %429 = vsyncpa [#allocation3 + $0x1], 1 }

</bundles_post_ra>
